<compile_context>
chip_gen: v6e
topology: v6e:2x2x1
jax: 0.10.0
libtpu: 0.0.40
codegen_flags: <defaults>
</compile_context>

<pallas_src>
import functools

import jax
import jax.numpy as jnp
from jax.experimental import pallas as pl
from jax.experimental.pallas import tpu as pltpu


def _round_up(n, m):
    return ((n + m - 1) // m) * m


def _global_module_kernel(x_ref, weu_ref, wev_ref, beu_ref, bev_ref,
                          gamma_ref, beta_ref, wpg_ref, wpu_ref, bp_ref,
                          o_ref, *, eps):
    # x_ref:      (tile_m, C_in)   bf16
    # weu/wev:    (C_in, half)     bf16
    # beu/bev:    (1, half)        f32
    # gamma/beta: (1, half)        f32
    # wpg/wpu:    (half, C_in)     bf16
    # bp:         (1, C_in)        f32
    x = x_ref[...]  # already bf16, fed straight to the MXU

    # expand: split Linear(C_in -> C_out) into the u and v halves (two dots,
    # f32 accumulation).
    u = jnp.dot(x, weu_ref[...], preferred_element_type=jnp.float32) + beu_ref[...]
    v = jnp.dot(x, wev_ref[...], preferred_element_type=jnp.float32) + bev_ref[...]

    # LayerNorm over the last dim of v (size = C_out // 2), all in f32.
    mean = jnp.mean(v, axis=-1, keepdims=True)
    centered = v - mean
    var = jnp.mean(centered * centered, axis=-1, keepdims=True)
    v_norm = centered * jax.lax.rsqrt(var + eps)
    v_norm = v_norm * gamma_ref[...] + beta_ref[...]

    # gating; the concat([gated_u, u]) @ wp is algebraically split into two
    # matmuls against the row-halves of wp, so no concat / extra VMEM copy.
    gated_u = u * jax.nn.sigmoid(v_norm)

    out = (jnp.dot(gated_u.astype(jnp.bfloat16), wpg_ref[...],
                   preferred_element_type=jnp.float32)
           + jnp.dot(u.astype(jnp.bfloat16), wpu_ref[...],
                     preferred_element_type=jnp.float32)
           + bp_ref[...])
    o_ref[...] = out.astype(o_ref.dtype)


def global_module_pallas(x, params, *, tile_m=512, eps=1e-5):
    """x: (B, H, W, C_in) float32.  Returns (B, H, W, C_in) float32."""
    B, H, W, C_in = x.shape
    we, be, gamma, beta, wp, bp = params
    C_out = we.shape[1]
    half = C_out // 2

    N = B * H * W
    # Effective row tile: multiple of 128 (MXU / bf16-sublane friendly on all
    # generations), no larger than the padded row count.
    tile = max(128, min(_round_up(tile_m, 128), _round_up(N, 128)))
    N_pad = _round_up(N, tile)

    x2d = x.reshape(N, C_in)
    if N_pad != N:
        x2d = jnp.pad(x2d, ((0, N_pad - N), (0, 0)))
    x2d = x2d.astype(jnp.bfloat16)

    # Split + cast weights once in the wrapper (not in the kernel).
    we_u = we[:, :half].astype(jnp.bfloat16)
    we_v = we[:, half:].astype(jnp.bfloat16)
    be_u = be[:half].reshape(1, half).astype(jnp.float32)
    be_v = be[half:].reshape(1, half).astype(jnp.float32)
    gamma2 = gamma.reshape(1, half).astype(jnp.float32)
    beta2 = beta.reshape(1, half).astype(jnp.float32)
    wp_g = wp[:half, :].astype(jnp.bfloat16)   # multiplies gated_u
    wp_u = wp[half:, :].astype(jnp.bfloat16)   # multiplies u
    bp2 = bp.reshape(1, C_in).astype(jnp.float32)

    grid = (N_pad // tile,)
    kernel = functools.partial(_global_module_kernel, eps=eps)

    weight_bytes = sum(int(w.size) * 2 for w in (we_u, we_v, wp_g, wp_u))
    cost = pl.CostEstimate(
        flops=4 * N_pad * C_in * C_out,                 # expand + projection
        transcendentals=N_pad * half,                   # sigmoid / rsqrt
        bytes_accessed=N_pad * C_in * (2 + 4) + weight_bytes,
    )

    out2d = pl.pallas_call(
        kernel,
        out_shape=jax.ShapeDtypeStruct((N_pad, C_in), jnp.float32),
        grid_spec=pltpu.PrefetchScalarGridSpec(
            num_scalar_prefetch=0,
            grid=grid,
            in_specs=[
                pl.BlockSpec((tile, C_in), lambda i: (i, 0)),   # x rows (bf16)
                pl.BlockSpec((C_in, half), lambda i: (0, 0)),   # we_u
                pl.BlockSpec((C_in, half), lambda i: (0, 0)),   # we_v
                pl.BlockSpec((1, half), lambda i: (0, 0)),      # be_u
                pl.BlockSpec((1, half), lambda i: (0, 0)),      # be_v
                pl.BlockSpec((1, half), lambda i: (0, 0)),      # ln gamma
                pl.BlockSpec((1, half), lambda i: (0, 0)),      # ln beta
                pl.BlockSpec((half, C_in), lambda i: (0, 0)),   # wp_g
                pl.BlockSpec((half, C_in), lambda i: (0, 0)),   # wp_u
                pl.BlockSpec((1, C_in), lambda i: (0, 0)),      # bp
            ],
            out_specs=pl.BlockSpec((tile, C_in), lambda i: (i, 0)),
        ),
        compiler_params=pltpu.CompilerParams(
            dimension_semantics=("parallel",)),
        cost_estimate=cost,
    )(x2d, we_u, we_v, be_u, be_v, gamma2, beta2, wp_g, wp_u, bp2)

    return out2d[:N].reshape(B, H, W, C_in)


def make_params(key, c_in, c_out):
    """Deterministic synthetic parameters mirroring the nn.Module shapes.

    PyTorch Linear stores weight as (out, in); here we store the transposed
    (in, out) layout so the kernel can do  y = x @ W + b  directly.
    """
    k1, k2, k3, k4 = jax.random.split(key, 4)
    we = jax.random.normal(k1, (c_in, c_out), jnp.float32) * (1.0 / jnp.sqrt(c_in))
    be = jax.random.normal(k2, (c_out,), jnp.float32) * 0.01
    gamma = jnp.ones((c_out // 2,), jnp.float32)          # LayerNorm weight
    beta = jnp.zeros((c_out // 2,), jnp.float32)          # LayerNorm bias
    wp = jax.random.normal(k3, (c_out, c_in), jnp.float32) * (1.0 / jnp.sqrt(c_out))
    bp = jax.random.normal(k4, (c_in,), jnp.float32) * 0.01
    return (we, be, gamma, beta, wp, bp)


def global_module_ref(x, params, eps=1e-5):
    """Pure-JAX f32 reference matching the PyTorch forward exactly."""
    we, be, gamma, beta, wp, bp = params
    B, H, W, C = x.shape
    h = x.reshape(B, H * W, C) @ we + be
    half = h.shape[-1] // 2
    u, v = h[..., :half], h[..., half:]
    mean = jnp.mean(v, axis=-1, keepdims=True)
    var = jnp.mean((v - mean) ** 2, axis=-1, keepdims=True)
    v = (v - mean) / jnp.sqrt(var + eps) * gamma + beta
    gated_u = u * jax.nn.sigmoid(v)
    combined = jnp.concatenate([gated_u, u], axis=-1)
    out = combined @ wp + bp
    return out.reshape(B, H, W, C)


if __name__ == "__main__":
    # Small shapes consistent with the module (output_channels = 2 * input_channels).
    C_IN, C_OUT = 128, 256

    key = jax.random.PRNGKey(0)
    kp, kdata = jax.random.split(key)
    params = make_params(kp, C_IN, C_OUT)

    # One tile-aligned shape and one that exercises the padded last tile.
    for shape in [(2, 8, 8, C_IN), (2, 5, 7, C_IN)]:
        kdata, sub = jax.random.split(kdata)
        x = jax.random.normal(sub, shape, jnp.float32)

        out = jax.block_until_ready(global_module_pallas(x, params))
        ref = global_module_ref(x, params)

        assert out.shape == shape
        # bf16 MXU inputs with f32 accumulation -> ~1e-3 relative error.
        rel_err = jnp.linalg.norm(out - ref) / jnp.linalg.norm(ref)
        assert rel_err < 2e-2, f"relative error {rel_err} too large for {shape}"

    print("KERNEL_OK")
</pallas_src>

<mosaic_0001>
module attributes {stable_mosaic.version = 11 : i64} {
  func.func @_global_module_kernel(%arg0: i32, %arg1: memref<128x128xbf16, #tpu.memory_space<vmem>>, %arg2: memref<128x128xbf16, #tpu.memory_space<vmem>>, %arg3: memref<128x128xbf16, #tpu.memory_space<vmem>>, %arg4: memref<1x128xf32, #tpu.memory_space<vmem>>, %arg5: memref<1x128xf32, #tpu.memory_space<vmem>>, %arg6: memref<1x128xf32, #tpu.memory_space<vmem>>, %arg7: memref<1x128xf32, #tpu.memory_space<vmem>>, %arg8: memref<128x128xbf16, #tpu.memory_space<vmem>>, %arg9: memref<128x128xbf16, #tpu.memory_space<vmem>>, %arg10: memref<1x128xf32, #tpu.memory_space<vmem>>, %arg11: memref<128x128xf32, #tpu.memory_space<vmem>>) attributes {dimension_semantics = [#tpu.dimension_semantics<parallel>], iteration_bounds = array<i64: 1>, scalar_prefetch = 0 : i64, scratch_operands = 0 : i64, tpu.core_type = #tpu.core_type<tc>, window_params = [{transform_indices = @transform_0, window_bounds = array<i64: 128, 128>}, {pipeline_mode = #tpu.pipeline_mode<synchronous>, transform_indices = @transform_1, window_bounds = array<i64: 128, 128>}, {pipeline_mode = #tpu.pipeline_mode<synchronous>, transform_indices = @transform_2, window_bounds = array<i64: 128, 128>}, {pipeline_mode = #tpu.pipeline_mode<synchronous>, transform_indices = @transform_3, window_bounds = array<i64: 1, 128>}, {pipeline_mode = #tpu.pipeline_mode<synchronous>, transform_indices = @transform_4, window_bounds = array<i64: 1, 128>}, {pipeline_mode = #tpu.pipeline_mode<synchronous>, transform_indices = @transform_5, window_bounds = array<i64: 1, 128>}, {pipeline_mode = #tpu.pipeline_mode<synchronous>, transform_indices = @transform_6, window_bounds = array<i64: 1, 128>}, {pipeline_mode = #tpu.pipeline_mode<synchronous>, transform_indices = @transform_7, window_bounds = array<i64: 128, 128>}, {pipeline_mode = #tpu.pipeline_mode<synchronous>, transform_indices = @transform_8, window_bounds = array<i64: 128, 128>}, {pipeline_mode = #tpu.pipeline_mode<synchronous>, transform_indices = @transform_9, window_bounds = array<i64: 1, 128>}, {transform_indices = @transform_10, window_bounds = array<i64: 128, 128>}]} {
    %c0 = arith.constant 0 : index
    %c0_0 = arith.constant 0 : index
    %0 = vector.load %arg1[%c0, %c0_0] : memref<128x128xbf16, #tpu.memory_space<vmem>>, vector<128x128xbf16>
    %c0_1 = arith.constant 0 : index
    %c0_2 = arith.constant 0 : index
    %1 = vector.load %arg2[%c0_1, %c0_2] : memref<128x128xbf16, #tpu.memory_space<vmem>>, vector<128x128xbf16>
    %cst = arith.constant dense<0.000000e+00> : vector<128x128xf32>
    %2 = tpu.matmul %0, %1, %cst {dimension_numbers = #tpu.dot_dimension_numbers<[1], [0], [0], [1], [0, 0, 1, 1], [], []>} : vector<128x128xbf16>, vector<128x128xbf16>, vector<128x128xf32> -> vector<128x128xf32>
    %c0_3 = arith.constant 0 : index
    %c0_4 = arith.constant 0 : index
    %3 = vector.load %arg4[%c0_3, %c0_4] : memref<1x128xf32, #tpu.memory_space<vmem>>, vector<1x128xf32>
    %4 = vector.broadcast %3 : vector<1x128xf32> to vector<128x128xf32>
    %5 = arith.addf %2, %4 : vector<128x128xf32>
    %c0_5 = arith.constant 0 : index
    %c0_6 = arith.constant 0 : index
    %6 = vector.load %arg3[%c0_5, %c0_6] : memref<128x128xbf16, #tpu.memory_space<vmem>>, vector<128x128xbf16>
    %cst_7 = arith.constant dense<0.000000e+00> : vector<128x128xf32>
    %7 = tpu.matmul %0, %6, %cst_7 {dimension_numbers = #tpu.dot_dimension_numbers<[1], [0], [0], [1], [0, 0, 1, 1], [], []>} : vector<128x128xbf16>, vector<128x128xbf16>, vector<128x128xf32> -> vector<128x128xf32>
    %c0_8 = arith.constant 0 : index
    %c0_9 = arith.constant 0 : index
    %8 = vector.load %arg5[%c0_8, %c0_9] : memref<1x128xf32, #tpu.memory_space<vmem>>, vector<1x128xf32>
    %9 = vector.broadcast %8 : vector<1x128xf32> to vector<128x128xf32>
    %10 = arith.addf %7, %9 : vector<128x128xf32>
    %cst_10 = arith.constant dense<0.000000e+00> : vector<128xf32>
    %11 = vector.multi_reduction <add>, %10, %cst_10 [1] : vector<128x128xf32> to vector<128xf32>
    %12 = vector.shape_cast %11 : vector<128xf32> to vector<128x1xf32>
    %cst_11 = arith.constant 1.280000e+02 : f32
    %13 = vector.broadcast %cst_11 : f32 to vector<128x1xf32>
    %14 = arith.divf %12, %13 : vector<128x1xf32>
    %15 = vector.broadcast %14 : vector<128x1xf32> to vector<128x128xf32>
    %16 = arith.subf %10, %15 : vector<128x128xf32>
    %17 = arith.mulf %16, %16 : vector<128x128xf32>
    %cst_12 = arith.constant dense<0.000000e+00> : vector<128xf32>
    %18 = vector.multi_reduction <add>, %17, %cst_12 [1] : vector<128x128xf32> to vector<128xf32>
    %19 = vector.shape_cast %18 : vector<128xf32> to vector<128x1xf32>
    %cst_13 = arith.constant 1.280000e+02 : f32
    %20 = vector.broadcast %cst_13 : f32 to vector<128x1xf32>
    %21 = arith.divf %19, %20 : vector<128x1xf32>
    %cst_14 = arith.constant 9.99999974E-6 : f32
    %22 = vector.broadcast %cst_14 : f32 to vector<128x1xf32>
    %23 = arith.addf %21, %22 : vector<128x1xf32>
    %24 = math.rsqrt %23 : vector<128x1xf32>
    %25 = vector.broadcast %24 : vector<128x1xf32> to vector<128x128xf32>
    %26 = arith.mulf %16, %25 : vector<128x128xf32>
    %c0_15 = arith.constant 0 : index
    %c0_16 = arith.constant 0 : index
    %27 = vector.load %arg6[%c0_15, %c0_16] : memref<1x128xf32, #tpu.memory_space<vmem>>, vector<1x128xf32>
    %28 = vector.broadcast %27 : vector<1x128xf32> to vector<128x128xf32>
    %29 = arith.mulf %26, %28 : vector<128x128xf32>
    %c0_17 = arith.constant 0 : index
    %c0_18 = arith.constant 0 : index
    %30 = vector.load %arg7[%c0_17, %c0_18] : memref<1x128xf32, #tpu.memory_space<vmem>>, vector<1x128xf32>
    %31 = vector.broadcast %30 : vector<1x128xf32> to vector<128x128xf32>
    %32 = arith.addf %29, %31 : vector<128x128xf32>
    %33 = arith.negf %32 : vector<128x128xf32>
    %34 = math.exp %33 : vector<128x128xf32>
    %cst_19 = arith.constant 1.000000e+00 : f32
    %35 = vector.broadcast %cst_19 : f32 to vector<128x128xf32>
    %36 = arith.addf %35, %34 : vector<128x128xf32>
    %37 = arith.divf %35, %36 : vector<128x128xf32>
    %38 = arith.mulf %5, %37 : vector<128x128xf32>
    %39 = arith.truncf %38 : vector<128x128xf32> to vector<128x128xbf16>
    %c0_20 = arith.constant 0 : index
    %c0_21 = arith.constant 0 : index
    %40 = vector.load %arg8[%c0_20, %c0_21] : memref<128x128xbf16, #tpu.memory_space<vmem>>, vector<128x128xbf16>
    %cst_22 = arith.constant dense<0.000000e+00> : vector<128x128xf32>
    %41 = tpu.matmul %39, %40, %cst_22 {dimension_numbers = #tpu.dot_dimension_numbers<[1], [0], [0], [1], [0, 0, 1, 1], [], []>} : vector<128x128xbf16>, vector<128x128xbf16>, vector<128x128xf32> -> vector<128x128xf32>
    %42 = arith.truncf %5 : vector<128x128xf32> to vector<128x128xbf16>
    %c0_23 = arith.constant 0 : index
    %c0_24 = arith.constant 0 : index
    %43 = vector.load %arg9[%c0_23, %c0_24] : memref<128x128xbf16, #tpu.memory_space<vmem>>, vector<128x128xbf16>
    %cst_25 = arith.constant dense<0.000000e+00> : vector<128x128xf32>
    %44 = tpu.matmul %42, %43, %cst_25 {dimension_numbers = #tpu.dot_dimension_numbers<[1], [0], [0], [1], [0, 0, 1, 1], [], []>} : vector<128x128xbf16>, vector<128x128xbf16>, vector<128x128xf32> -> vector<128x128xf32>
    %45 = arith.addf %41, %44 : vector<128x128xf32>
    %c0_26 = arith.constant 0 : index
    %c0_27 = arith.constant 0 : index
    %46 = vector.load %arg10[%c0_26, %c0_27] : memref<1x128xf32, #tpu.memory_space<vmem>>, vector<1x128xf32>
    %47 = vector.broadcast %46 : vector<1x128xf32> to vector<128x128xf32>
    %48 = arith.addf %45, %47 : vector<128x128xf32>
    %c0_28 = arith.constant 0 : index
    %c0_29 = arith.constant 0 : index
    %49 = vector.load %arg11[%c0_28, %c0_29] : memref<128x128xf32, #tpu.memory_space<vmem>>, vector<128x128xf32>
    tpu.vector_store %arg11[%c0_28, %c0_29], %48 {strides = array<i32>} : memref<128x128xf32, #tpu.memory_space<vmem>>, vector<128x128xf32>,
    return
  }
  func.func @transform_0(%arg0: i32) -> (i32, i32) {
    %c0_i32 = arith.constant 0 : i32
    %c0_i32_0 = arith.constant 0 : i32
    return %arg0, %c0_i32 : i32, i32
  }
  func.func @transform_1(%arg0: i32) -> (i32, i32) {
    %c0_i32 = arith.constant 0 : i32
    %c0_i32_0 = arith.constant 0 : i32
    %c0_i32_1 = arith.constant 0 : i32
    return %c0_i32, %c0_i32_0 : i32, i32
  }
  func.func @transform_2(%arg0: i32) -> (i32, i32) {
    %c0_i32 = arith.constant 0 : i32
    %c0_i32_0 = arith.constant 0 : i32
    %c0_i32_1 = arith.constant 0 : i32
    return %c0_i32, %c0_i32_0 : i32, i32
  }
  func.func @transform_3(%arg0: i32) -> (i32, i32) {
    %c0_i32 = arith.constant 0 : i32
    %c0_i32_0 = arith.constant 0 : i32
    %c0_i32_1 = arith.constant 0 : i32
    return %c0_i32, %c0_i32_0 : i32, i32
  }
  func.func @transform_4(%arg0: i32) -> (i32, i32) {
    %c0_i32 = arith.constant 0 : i32
    %c0_i32_0 = arith.constant 0 : i32
    %c0_i32_1 = arith.constant 0 : i32
    return %c0_i32, %c0_i32_0 : i32, i32
  }
  func.func @transform_5(%arg0: i32) -> (i32, i32) {
    %c0_i32 = arith.constant 0 : i32
    %c0_i32_0 = arith.constant 0 : i32
    %c0_i32_1 = arith.constant 0 : i32
    return %c0_i32, %c0_i32_0 : i32, i32
  }
  func.func @transform_6(%arg0: i32) -> (i32, i32) {
    %c0_i32 = arith.constant 0 : i32
    %c0_i32_0 = arith.constant 0 : i32
    %c0_i32_1 = arith.constant 0 : i32
    return %c0_i32, %c0_i32_0 : i32, i32
  }
  func.func @transform_7(%arg0: i32) -> (i32, i32) {
    %c0_i32 = arith.constant 0 : i32
    %c0_i32_0 = arith.constant 0 : i32
    %c0_i32_1 = arith.constant 0 : i32
    return %c0_i32, %c0_i32_0 : i32, i32
  }
  func.func @transform_8(%arg0: i32) -> (i32, i32) {
    %c0_i32 = arith.constant 0 : i32
    %c0_i32_0 = arith.constant 0 : i32
    %c0_i32_1 = arith.constant 0 : i32
    return %c0_i32, %c0_i32_0 : i32, i32
  }
  func.func @transform_9(%arg0: i32) -> (i32, i32) {
    %c0_i32 = arith.constant 0 : i32
    %c0_i32_0 = arith.constant 0 : i32
    %c0_i32_1 = arith.constant 0 : i32
    return %c0_i32, %c0_i32_0 : i32, i32
  }
  func.func @transform_10(%arg0: i32) -> (i32, i32) {
    %c0_i32 = arith.constant 0 : i32
    %c0_i32_0 = arith.constant 0 : i32
    return %arg0, %c0_i32 : i32, i32
  }
}

</mosaic_0001>

<bundles_post_ra>
// kernel: tpu_custom_call.1
= control target key start
LH: loop header
LB: loop body
LE: loop exit
PB: predicated region body
PF: predicated region fallthrough
CT: control target
= control target key end

     0   :  { %15 = vsyncpa [#allocation3], 0  ;;  %s2102_s0 = inlined_call_operand.hbm [shape: bf16[128,128], index: 0, kind: input, shape index: {}]   ;;  %s2103_s1 = inlined_call_operand.hbm [shape: bf16[128,128], index: 1, kind: input, shape index: {}]   ;;  %s2104_s2 = inlined_call_operand.hbm [shape: bf16[128,128], index: 2, kind: input, shape index: {}]   ;;  %s2105_s3 = inlined_call_operand.vmem [shape: f32[1,128], index: 3, kind: input, shape index: {}]   ;;  %s2106_s4 = inlined_call_operand.vmem [shape: f32[1,128], index: 4, kind: input, shape index: {}]   ;;  %s2107_s5 = inlined_call_operand.vmem [shape: f32[1,128], index: 5, kind: input, shape index: {}]   ;;  %s2108_s6 = inlined_call_operand.vmem [shape: f32[1,128], index: 6, kind: input, shape index: {}]   ;;  %s2109_s7 = inlined_call_operand.hbm [shape: bf16[128,128], index: 7, kind: input, shape index: {}]   ;;  %s2110_s8 = inlined_call_operand.hbm [shape: bf16[128,128], index: 8, kind: input, shape index: {}]   ;;  %s2111_s9 = inlined_call_operand.vmem [shape: f32[1,128], index: 9, kind: input, shape index: {}]   ;;  %s2112_s10 = inlined_call_operand.hbm [shape: f32[128,128], index: 10, kind: output, shape index: {}]  }
   0x1   :  { %16 = vsyncpa [#allocation6], 0 }
   0x2   :  { %17 = vsyncpa [#allocation9], 0 }
   0x3   :  { %18 = vsyncpa [#allocation4], 0  ;;  %s1763_s13 = smov [#allocation5]   ;;  %s1764_s15 = smov [#allocation8]  }
   0x4   :  { %s36_s14 = sshll.u32 %s1763_s13, 4  ;;  %s68_s16 = sshll.u32 %s1764_s15, 4  ;;  %s37_s14 = int_to_ptr.vmem [resolvable:$true] %s36_s14  ;;  %s69_s16 = int_to_ptr.vmem [resolvable:$true] %s68_s16 }
   0x5   :  { %s1643_s17 = scalar_lea.vmem %s37_s14, 1024  ;;  %p1648_p1 = scmp.lt.s32.totalorder %s37_s14, %s37_s14 }
   0x6   :  { %p1644_p0 = scmp.ne.s32.totalorder %s37_s14, %s1643_s17  ;;  %p1649_p2 = scmp.lt.s32.totalorder %s1643_s17, %s1643_s17 }
   0x8   :  { %p1650_p3 = por %p1649_p2, %p1648_p1 }
   0xa   :  { %p1651_p4 = pnand %p1650_p3, %p1644_p0 }
   0xc   :  { %1654 = shalt.err (!%p1651_p4)
}
   0xd   :  { %s1765_s18 = smov 64   ;;  %s1766_s19 = smov 4  }
   0xe   :  { %42 = dma.hbm_to_vmem [thread:$0]  %s2103_s1, 1024, %s37_s14, [#allocation6], %s1765_s18, %s1765_s18, %s1766_s19  }
   0xf   :  { %s1663_s22 = scalar_lea.vmem %s69_s16, 1024  ;;  %p1668_p6 = scmp.lt.s32.totalorder %s69_s16, %s69_s16 }
  0x10   :  { %p1664_p5 = scmp.ne.s32.totalorder %s69_s16, %s1663_s22  ;;  %p1669_p7 = scmp.lt.s32.totalorder %s1663_s22, %s1663_s22 }
  0x12   :  { %p1670_p8 = por %p1669_p7, %p1668_p6 }
  0x14   :  { %p1671_p9 = pnand %p1670_p8, %p1664_p5 }
  0x16   :  { %1674 = shalt.err (!%p1671_p9)
}
  0x17   :  { %74 = dma.hbm_to_vmem [thread:$0]  %s2109_s7, 1024, %s69_s16, [#allocation9], %s1765_s18, %s1765_s18, %s1766_s19  }
  0x18   :  { %s1767_s25 = smov [#allocation2]   ;;  %s1768_s27 = smov [#allocation7]  }
  0x19   :  { %s24_s26 = sshll.u32 %s1767_s25, 4  ;;  %s48_s28 = sshll.u32 %s1768_s27, 4  ;;  %s25_s26 = int_to_ptr.vmem [resolvable:$true] %s24_s26  ;;  %s49_s28 = int_to_ptr.vmem [resolvable:$true] %s48_s28 }
  0x1a   :  { %s1683_s1 = scalar_lea.vmem %s25_s26, 1024  ;;  %p1688_p11 = scmp.lt.s32.totalorder %s25_s26, %s25_s26 }
  0x1b   :  { %p1684_p10 = scmp.ne.s32.totalorder %s25_s26, %s1683_s1  ;;  %p1689_p12 = scmp.lt.s32.totalorder %s1683_s1, %s1683_s1 }
  0x1d   :  { %p1690_p13 = por %p1689_p12, %p1688_p11 }
  0x1f   :  { %p1691_p0 = pnand %p1690_p13, %p1684_p10 }
  0x21   :  { %1694 = shalt.err (!%p1691_p0)
}
  0x22   :  { %30 = dma.hbm_to_vmem [thread:$0]  %s2102_s0, 1024, %s25_s26, [#allocation3], %s1765_s18, %s1765_s18, %s1766_s19  }
  0x23   :  { %s1703_s7 = scalar_lea.vmem %s49_s28, 1024  ;;  %p1708_p2 = scmp.lt.s32.totalorder %s49_s28, %s49_s28 }
  0x24   :  { %p1704_p1 = scmp.ne.s32.totalorder %s49_s28, %s1703_s7  ;;  %p1709_p3 = scmp.lt.s32.totalorder %s1703_s7, %s1703_s7 }
  0x26   :  { %p1710_p4 = por %p1709_p3, %p1708_p2 }
  0x28   :  { %p1711_p5 = pnand %p1710_p4, %p1704_p1 }
  0x2a   :  { %1714 = shalt.err (!%p1711_p5)
}
  0x2b   :  { %54 = dma.hbm_to_vmem [thread:$0]  %s2104_s2, 1024, %s49_s28, [#allocation6], %s1765_s18, %s1765_s18, %s1766_s19  }
  0x2c   :  { %s1769_s13 = smov [#allocation10]  }
  0x2d   :  { %s80_s14 = sshll.u32 %s1769_s13, 4  ;;  %s81_s14 = int_to_ptr.vmem [resolvable:$true] %s80_s14 }
  0x2e   :  { %s1723_s15 = scalar_lea.vmem %s81_s14, 1024  ;;  %p1728_p7 = scmp.lt.s32.totalorder %s81_s14, %s81_s14 }
  0x2f   :  { %p1724_p6 = scmp.ne.s32.totalorder %s81_s14, %s1723_s15  ;;  %p1729_p8 = scmp.lt.s32.totalorder %s1723_s15, %s1723_s15 }
  0x31   :  { %p1730_p9 = por %p1729_p8, %p1728_p7 }
  0x33   :  { %p1731_p10 = pnand %p1730_p9, %p1724_p6 }
  0x35   :  { %1734 = shalt.err (!%p1731_p10)
}
  0x36   :  { %86 = dma.hbm_to_vmem [thread:$0]  %s2110_s8, 1024, %s81_s14, [#allocation9], %s1765_s18, %s1765_s18, %s1766_s19  }
  0x37   :  { %1755 = dma.done.wait [#allocation3], 1024  }
  0x38   :  { %1756 = vsyncadd [#allocation3], 4294966272 }
  0x39   :  { %1757 = dma.done.wait [#allocation6], 2048  }
  0x3a   :  { %1758 = vsyncadd [#allocation6], 4294965248 }
  0x3b   :  { %1759 = dma.done.wait [#allocation9], 2048  }
  0x3c   :  { %1760 = vsyncadd [#allocation9], 4294965248  ;;  %v1499_v0 = vld [vmem:[#allocation7 + $0x38] sm:$0xff]   ;;  %v1500_v1 = vld [vmem:[#allocation7 + $0x30] sm:$0xff]  }
  0x3d   :  { %1393 = vmatprep.subr.bf16.mxu1 %v1499_v0  ;;  %v1501_v2 = vld [vmem:[#allocation7 + $0x28] sm:$0xff]   ;;  %v1502_v3 = vld [vmem:[#allocation7 + $0x20] sm:$0xff]   ;;  %v1503_v5 = vld [vmem:[#allocation7 + $0x18] sm:$0xff]  }
  0x3e   :  { %1394 = vmatpush3.bf16.msra.mxu1 %v1499_v0  ;;  %v1507_v4 = vld [vmem:[#allocation2] sm:$0xff]   ;;  %v1504_v6 = vld [vmem:[#allocation7 + $0x10] sm:$0xff]   ;;  %v1505_v7 = vld [vmem:[#allocation7 + $0x8] sm:$0xff]  }
  0x3f   :  { %1395 = vmatprep.subr.bf16.mxu1 %v1500_v1  ;;  %1409 = vmatprep.mubr.bf16.mxu1 %v1507_v4  ;;  %v1506_v8 = vld [vmem:[#allocation7] sm:$0xff]   ;;  %v1508_v9 = vld [vmem:[#allocation2 + $0x8] sm:$0xff]   ;;  %v1509_v10 = vld [vmem:[#allocation2 + $0x10] sm:$0xff]  }
  0x40   :  { %1377 = vmatprep.mubr.bf16.mxu0 %v1507_v4  ;;  %v1510_v11 = vld [vmem:[#allocation2 + $0x18] sm:$0xff]   ;;  %v1511_v12 = vld [vmem:[#allocation2 + $0x20] sm:$0xff]   ;;  %v1512_v13 = vld [vmem:[#allocation2 + $0x28] sm:$0xff]  }
  0x41   :  { %v1513_v14 = vld [vmem:[#allocation2 + $0x30] sm:$0xff]   ;;  %v1514_v15 = vld [vmem:[#allocation2 + $0x38] sm:$0xff]   ;;  %v1517_v18 = vld [vmem:[#allocation5 + $0x28] sm:$0xff]  }
  0x42   :  { %1396 = vmatpush3.bf16.msra.mxu1 %v1500_v1  ;;  %v1515_v16 = vld [vmem:[#allocation5 + $0x38] sm:$0xff]   ;;  %v1516_v17 = vld [vmem:[#allocation5 + $0x30] sm:$0xff]   ;;  %v1518_v19 = vld [vmem:[#allocation5 + $0x20] sm:$0xff]  }
  0x43   :  { %1397 = vmatprep.subr.bf16.mxu1 %v1501_v2  ;;  %1361 = vmatprep.subr.bf16.mxu0 %v1515_v16  ;;  %v1519_v20 = vld [vmem:[#allocation5 + $0x18] sm:$0xff]   ;;  %v1520_v21 = vld [vmem:[#allocation5 + $0x10] sm:$0xff]   ;;  %v1521_v22 = vld [vmem:[#allocation5 + $0x8] sm:$0xff]  }
  0x44   :  { %1362 = vmatpush3.bf16.msra.mxu0 %v1515_v16  ;;  %v1522_v23 = vld [vmem:[#allocation5] sm:$0xff]  }
  0x45   :  { %1363 = vmatprep.subr.bf16.mxu0 %v1516_v17  ;;  %v1253_v24 = vld [vmem:[%s2106_s4] ss:$0 sm:$0xff] }
  0x46   :  { %1398 = vmatpush3.bf16.msra.mxu1 %v1501_v2 }
  0x47   :  { %1399 = vmatprep.subr.bf16.mxu1 %v1502_v3 }
  0x48   :  { %1364 = vmatpush3.bf16.msra.mxu0 %v1516_v17 }
  0x49   :  { %1365 = vmatprep.subr.bf16.mxu0 %v1517_v18 }
  0x4a   :  { %1400 = vmatpush3.bf16.msra.mxu1 %v1502_v3 }
  0x4b   :  { %1401 = vmatprep.subr.bf16.mxu1 %v1503_v5 }
  0x4c   :  { %1366 = vmatpush3.bf16.msra.mxu0 %v1517_v18 }
  0x4d   :  { %1367 = vmatprep.subr.bf16.mxu0 %v1518_v19 }
  0x4e   :  { %1402 = vmatpush3.bf16.msra.mxu1 %v1503_v5 }
  0x4f   :  { %1403 = vmatprep.subr.bf16.mxu1 %v1504_v6 }
  0x50   :  { %1368 = vmatpush3.bf16.msra.mxu0 %v1518_v19 }
  0x51   :  { %1369 = vmatprep.subr.bf16.mxu0 %v1519_v20 }
  0x52   :  { %1404 = vmatpush3.bf16.msra.mxu1 %v1504_v6 }
  0x53   :  { %1405 = vmatprep.subr.bf16.mxu1 %v1505_v7 }
  0x54   :  { %1370 = vmatpush3.bf16.msra.mxu0 %v1519_v20 }
  0x55   :  { %1371 = vmatprep.subr.bf16.mxu0 %v1520_v21 }
  0x56   :  { %1406 = vmatpush3.bf16.msra.mxu1 %v1505_v7 }
  0x57   :  { %1407 = vmatprep.subr.bf16.mxu1 %v1506_v8 }
  0x58   :  { %1372 = vmatpush3.bf16.msra.mxu0 %v1520_v21 }
  0x59   :  { %1373 = vmatprep.subr.bf16.mxu0 %v1521_v22 }
  0x5a   :  { %1408 = vmatpush3.bf16.msra.mxu1 %v1506_v8 }
  0x5c   :  { %1374 = vmatpush3.bf16.msra.mxu0 %v1521_v22 }
  0x5d   :  { %1410 = vmatmul.mubr.bf16.vlgmr.msra.gmra.mxu1 %v1508_v9  ;;  %1375 = vmatprep.subr.bf16.mxu0 %v1522_v23 }
  0x5e   :  { %1413 = vmatprep.mubr.bf16.mxu1 %v1509_v10 }
  0x60   :  { %1376 = vmatpush3.bf16.msra.mxu0 %v1522_v23 }
  0x63   :  { %1378 = vmatmul.mubr.bf16.vlgmr.msra.gmra.mxu0 %v1508_v9 }
  0x64   :  { %1381 = vmatprep.mubr.bf16.mxu0 %v1509_v10 }
  0x65   :  { %1414 = vmatmul.mubr.bf16.gmra.mxu1 %v1510_v11 }
  0x66   :  { %1417 = vmatprep.mubr.bf16.mxu1 %v1511_v12 }
  0x6b   :  { %1382 = vmatmul.mubr.bf16.gmra.mxu0 %v1510_v11 }
  0x6c   :  { %1385 = vmatprep.mubr.bf16.mxu0 %v1511_v12 }
  0x6d   :  { %1418 = vmatmul.mubr.bf16.gmra.mxu1 %v1512_v13 }
  0x6e   :  { %1421 = vmatprep.mubr.bf16.mxu1 %v1513_v14 }
  0x73   :  { %1386 = vmatmul.mubr.bf16.gmra.mxu0 %v1512_v13 }
  0x74   :  { %1389 = vmatprep.mubr.bf16.mxu0 %v1513_v14 }
  0x75   :  { %1422 = vmatmul.mubr.bf16.gmra.mxu1 %v1514_v15 }
  0x7b   :  { %1390 = vmatmul.mubr.bf16.gmra.mxu0 %v1514_v15 }
 0x11d   :  { %v1411_v25 = vpop.f32.mrf.mxu1 }
 0x11e   :  { %v451_v26 = vadd.f32 %v1411_v25, %v1253_v24 }
 0x11f   :  { %v442_v27 = vpop.f32.mrf.mxu1 }
 0x120   :  { %v443_v28 = vadd.f32 %v1253_v24, %v442_v27  ;;  %509 = vadd.xlane.f32.xlu1 %v451_v26 }
 0x121   :  { %v1412_v29 = vpop.f32.mrf.mxu1 }
 0x122   :  { %v454_v30 = vadd.f32 %v1412_v29, %v1253_v24  ;;  %505 = vadd.xlane.f32.xlu0 %v443_v28 }
 0x123   :  { %v445_v31 = vpop.f32.mrf.mxu1 }
 0x124   :  { %v446_v32 = vadd.f32 %v1253_v24, %v445_v31  ;;  %511 = vadd.xlane.f32.xlu1 %v454_v30 }
 0x125   :  { %v1415_v33 = vpop.f32.mrf.mxu1 }
 0x126   :  { %507 = vadd.xlane.f32.xlu0 %v446_v32  ;;  %v467_v38 = vadd.f32 %v1415_v33, %v1253_v24 }
 0x127   :  { %v458_v34 = vpop.f32.mrf.mxu1 }
 0x128   :  { %v459_v35 = vadd.f32 %v1253_v24, %v458_v34 }
 0x129   :  { %v1416_v36 = vpop.f32.mrf.mxu1 }
 0x12a   :  { %513 = vadd.xlane.f32.xlu0 %v459_v35  ;;  %v470_v42 = vadd.f32 %v1416_v36, %v1253_v24 }
 0x12b   :  { %v461_v37 = vpop.f32.mrf.mxu1 }
 0x12c   :  { %v462_v39 = vadd.f32 %v1253_v24, %v461_v37 }
 0x12d   :  { %v1419_v40 = vpop.f32.mrf.mxu1 }
 0x12e   :  { %515 = vadd.xlane.f32.xlu1 %v462_v39  ;;  %517 = vadd.xlane.f32.xlu0 %v467_v38  ;;  %v1861_v46 = vadd.f32 %v1419_v40, %v1253_v24 }
 0x12f   :  { %v474_v41 = vpop.f32.mrf.mxu1 }
 0x130   :  { %v475_v43 = vadd.f32 %v1253_v24, %v474_v41 }
 0x131   :  { %v1420_v44 = vpop.f32.mrf.mxu1 }
 0x132   :  { %519 = vadd.xlane.f32.xlu1 %v470_v42  ;;  %521 = vadd.xlane.f32.xlu0 %v475_v43  ;;  %v1867_v50 = vadd.f32 %v1420_v44, %v1253_v24 }
 0x133   :  { %v477_v45 = vpop.f32.mrf.mxu1 }
 0x134   :  { %v1863_v47 = vadd.f32 %v1253_v24, %v477_v45 }
 0x135   :  { %v1423_v48 = vpop.f32.mrf.mxu1 }
 0x136   :  { %523 = vadd.xlane.f32.xlu1 %v1863_v47  ;;  %525 = vadd.xlane.f32.xlu0 %v1861_v46  ;;  %v1873_v54 = vadd.f32 %v1423_v48, %v1253_v24 }
 0x137   :  { %v490_v49 = vpop.f32.mrf.mxu1 }
 0x138   :  { %v1869_v51 = vadd.f32 %v1253_v24, %v490_v49 }
 0x139   :  { %v1424_v52 = vpop.f32.mrf.mxu1 }
 0x13a   :  { %527 = vadd.xlane.f32.xlu1 %v1867_v50  ;;  %529 = vadd.xlane.f32.xlu0 %v1869_v51  ;;  %v1879_v56 = vadd.f32 %v1424_v52, %v1253_v24 }
 0x13b   :  { %v493_v53 = vpop.f32.mrf.mxu1 }
 0x13c   :  { %v1875_v55 = vadd.f32 %v1253_v24, %v493_v53 }
 0x13e   :  { %531 = vadd.xlane.f32.xlu1 %v1875_v55  ;;  %533 = vadd.xlane.f32.xlu0 %v1873_v54 }
 0x142   :  { %535 = vadd.xlane.f32.xlu1 %v1879_v56 }
 0x1a9   :  { %v510_v57 = vpop.xlane.xlu1 %509 }
 0x1aa   :  { %v540_v59 = vmul.f32 0.0078125, %v510_v57 }
 0x1ab   :  { %v506_v58 = vpop.xlane.xlu0 %505 }
 0x1ac   :  { %v538_v60 = vmul.f32 0.0078125, %v506_v58  ;;  %v1884_v0 = vsub.f32 %v451_v26, %v540_v59  ;;  %v1524_v59 = vld [vmem:[#allocation10 + $0x30] sm:$0xff]  }
 0x1ad   :  { %v512_v61 = vpop.xlane.xlu1 %511 }
 0x1ae   :  { %v1882_v62 = vsub.f32 %v443_v28, %v538_v60  ;;  %v541_v1 = vmul.f32 0.0078125, %v512_v61  ;;  %v572_v8 = vmul.f32 %v1884_v0, %v1884_v0  ;;  %v1525_v60 = vld [vmem:[#allocation10 + $0x28] sm:$0xff]   ;;  %v1526_v61 = vld [vmem:[#allocation10 + $0x20] sm:$0xff]  }
 0x1af   :  { %v508_v63 = vpop.xlane.xlu0 %507 }
 0x1b0   :  { %v539_v2 = vmul.f32 0.0078125, %v508_v63  ;;  %v570_v3 = vmul.f32 %v1882_v62, %v1882_v62  ;;  %v1890_v6 = vsub.f32 %v454_v30, %v541_v1  ;;  %v1528_v63 = vld [vmem:[#allocation10 + $0x18] sm:$0xff]   ;;  %v1529_v1 = vld [vmem:[#allocation8 + $0x30] sm:$0xff]  }
 0x1b2   :  { %v1888_v4 = vsub.f32 %v446_v32, %v539_v2  ;;  %586 = vadd.xlane.f32.xlu0 %v570_v3  ;;  %v573_v15 = vmul.f32 %v1890_v6, %v1890_v6  ;;  %v1530_v2 = vld [vmem:[#allocation10 + $0x10] sm:$0xff]   ;;  %v1379_v3 = vpop.f32.mrf.mxu0 }
 0x1b3   :  { %v514_v5 = vpop.xlane.xlu0 %513 }
 0x1b4   :  { %v542_v7 = vmul.f32 0.0078125, %v514_v5  ;;  %v571_v9 = vmul.f32 %v1888_v4, %v1888_v4  ;;  %v1531_v5 = vld [vmem:[#allocation8 + $0x28] sm:$0xff]  }
 0x1b6   :  { %v1896_v10 = vsub.f32 %v459_v35, %v542_v7  ;;  %590 = vadd.xlane.f32.xlu0 %v572_v8  ;;  %588 = vadd.xlane.f32.xlu1 %v571_v9  ;;  %v274_v7 = vpop.f32.mrf.mxu0  ;;  %v1532_v8 = vld [vmem:[#allocation10 + $0x8] sm:$0xff]  }
 0x1b7   :  { %v516_v11 = vpop.xlane.xlu1 %515  ;;  %v518_v12 = vpop.xlane.xlu0 %517 }
 0x1b8   :  { %v543_v13 = vmul.f32 0.0078125, %v516_v11  ;;  %v544_v14 = vmul.f32 0.0078125, %v518_v12  ;;  %v574_v16 = vmul.f32 %v1896_v10, %v1896_v10  ;;  %v1380_v9 = vpop.f32.mrf.mxu0  ;;  %v1533_v11 = vld [vmem:[#allocation8 + $0x20] sm:$0xff]  }
 0x1b9   :  { %v1236_v12 = vld [vmem:[%s2105_s3] ss:$0 sm:$0xff] }
 0x1ba   :  { %v1902_v17 = vsub.f32 %v462_v39, %v543_v13  ;;  %v1904_v18 = vsub.f32 %v467_v38, %v544_v14  ;;  %592 = vadd.xlane.f32.xlu1 %v573_v15  ;;  %594 = vadd.xlane.f32.xlu0 %v574_v16  ;;  %v277_v13 = vpop.f32.mrf.mxu0  ;;  %v1956_v14 = vadd.f32 %v1236_v12, %v274_v7  ;;  %v1534_v16 = vld [vmem:[#allocation10] sm:$0xff]  }
 0x1bb   :  { %v520_v19 = vpop.xlane.xlu1 %519  ;;  %v522_v20 = vpop.xlane.xlu0 %521  ;;  %v1958_v15 = vadd.f32 %v1236_v12, %v277_v13 }
 0x1bc   :  { %v545_v21 = vmul.f32 0.0078125, %v520_v19  ;;  %v546_v22 = vmul.f32 0.0078125, %v522_v20  ;;  %v575_v23 = vmul.f32 %v1902_v17, %v1902_v17  ;;  %v576_v24 = vmul.f32 %v1904_v18, %v1904_v18 }
 0x1bd   :  { %v1960_v19 = vadd.f32 %v1379_v3, %v1236_v12  ;;  %v1962_v20 = vadd.f32 %v1380_v9, %v1236_v12 }
 0x1be   :  { %v1910_v25 = vsub.f32 %v470_v42, %v545_v21  ;;  %v1912_v26 = vsub.f32 %v475_v43, %v546_v22  ;;  %596 = vadd.xlane.f32.xlu1 %v575_v23  ;;  %598 = vadd.xlane.f32.xlu0 %v576_v24  ;;  %v1383_v21 = vpop.f32.mrf.mxu0  ;;  %v864_v22 = vpack.c.bf16 %v1958_v15, %v1956_v14  ;;  %v1535_v24 = vld [vmem:[#allocation8 + $0x18] sm:$0xff]  }
 0x1bf   :  { %v524_v27 = vpop.xlane.xlu1 %523  ;;  %v526_v28 = vpop.xlane.xlu0 %525  ;;  %v865_v23 = vpack.c.bf16 %v1962_v20, %v1960_v19 }
 0x1c0   :  { %v547_v29 = vmul.f32 0.0078125, %v524_v27  ;;  %v548_v30 = vmul.f32 0.0078125, %v526_v28  ;;  %v577_v31 = vmul.f32 %v1910_v25, %v1910_v25  ;;  %v578_v32 = vmul.f32 %v1912_v26, %v1912_v26  ;;  %v290_v27 = vpop.f32.mrf.mxu0  ;;  %1441 = vmatprep.mubr.bf16.mxu0 %v864_v22 }
 0x1c2   :  { %v1919_v33 = vsub.f32 %v1863_v47, %v547_v29  ;;  %v1922_v34 = vsub.f32 %v1861_v46, %v548_v30  ;;  %600 = vadd.xlane.f32.xlu1 %v577_v31  ;;  %602 = vadd.xlane.f32.xlu0 %v578_v32  ;;  %v1384_v28 = vpop.f32.mrf.mxu0  ;;  %v1536_v29 = vld [vmem:[#allocation8 + $0x10] sm:$0xff]   ;;  %v1968_v31 = vadd.f32 %v1383_v21, %v1236_v12 }
 0x1c3   :  { %v528_v35 = vpop.xlane.xlu1 %527  ;;  %v530_v36 = vpop.xlane.xlu0 %529  ;;  %v1970_v32 = vadd.f32 %v1236_v12, %v290_v27 }
 0x1c4   :  { %v549_v37 = vmul.f32 0.0078125, %v528_v35  ;;  %v550_v38 = vmul.f32 0.0078125, %v530_v36  ;;  %v579_v39 = vmul.f32 %v1919_v33, %v1919_v33  ;;  %v580_v40 = vmul.f32 %v1922_v34, %v1922_v34  ;;  %v293_v30 = vpop.f32.mrf.mxu0 }
 0x1c5   :  { %v1972_v35 = vadd.f32 %v1236_v12, %v293_v30  ;;  %v1974_v36 = vadd.f32 %v1384_v28, %v1236_v12 }
 0x1c6   :  { %v1929_v41 = vsub.f32 %v1867_v50, %v549_v37  ;;  %v1932_v42 = vsub.f32 %v1869_v51, %v550_v38  ;;  %604 = vadd.xlane.f32.xlu1 %v579_v39  ;;  %606 = vadd.xlane.f32.xlu0 %v580_v40  ;;  %v1387_v37 = vpop.f32.mrf.mxu0  ;;  %v1537_v39 = vld [vmem:[#allocation8 + $0x8] sm:$0xff]  }
 0x1c7   :  { %v532_v43 = vpop.xlane.xlu1 %531  ;;  %v534_v44 = vpop.xlane.xlu0 %533  ;;  %v866_v38 = vpack.c.bf16 %v1972_v35, %v1970_v32  ;;  %v867_v40 = vpack.c.bf16 %v1974_v36, %v1968_v31 }
 0x1c8   :  { %v551_v45 = vmul.f32 0.0078125, %v532_v43  ;;  %v552_v46 = vmul.f32 0.0078125, %v534_v44  ;;  %v581_v47 = vmul.f32 %v1929_v41, %v1929_v41  ;;  %v582_v48 = vmul.f32 %v1932_v42, %v1932_v42  ;;  %v306_v43 = vpop.f32.mrf.mxu0 }
 0x1ca   :  { %v1939_v49 = vsub.f32 %v1875_v55, %v551_v45  ;;  %v1942_v50 = vsub.f32 %v1873_v54, %v552_v46  ;;  %608 = vadd.xlane.f32.xlu1 %v581_v47  ;;  %610 = vadd.xlane.f32.xlu0 %v582_v48  ;;  %v1523_v54 = vld [vmem:[#allocation10 + $0x38] sm:$0xff]   ;;  %v1388_v44 = vpop.f32.mrf.mxu0  ;;  %v1538_v46 = vld [vmem:[#allocation8] sm:$0xff]   ;;  %v1980_v47 = vadd.f32 %v1236_v12, %v306_v43 }
 0x1cb   :  { %v536_v51 = vpop.xlane.xlu1 %535  ;;  %1425 = vmatprep.subr.bf16.mxu0 %v1523_v54 }
 0x1cc   :  { %v553_v52 = vmul.f32 0.0078125, %v536_v51  ;;  %v583_v53 = vmul.f32 %v1939_v49, %v1939_v49  ;;  %v584_v57 = vmul.f32 %v1942_v50, %v1942_v50  ;;  %1426 = vmatpush3.bf16.msra.mxu0 %v1523_v54  ;;  %v309_v45 = vpop.f32.mrf.mxu0  ;;  %v1984_v51 = vadd.f32 %v1387_v37, %v1236_v12 }
 0x1cd   :  { %1427 = vmatprep.subr.bf16.mxu0 %v1524_v59  ;;  %v1982_v48 = vadd.f32 %v1236_v12, %v309_v45 }
 0x1ce   :  { %v1949_v58 = vsub.f32 %v1879_v56, %v553_v52  ;;  %612 = vadd.xlane.f32.xlu1 %v583_v53  ;;  %614 = vadd.xlane.f32.xlu0 %v584_v57  ;;  %v1527_v56 = vld [vmem:[#allocation8 + $0x38] sm:$0xff]   ;;  %v1986_v52 = vadd.f32 %v1388_v44, %v1236_v12  ;;  %v1391_v53 = vpop.f32.mrf.mxu0 }
 0x1cf   :  { %1457 = vmatprep.subr.bf16.mxu1 %v1527_v56 }
 0x1d0   :  { %v585_v55 = vmul.f32 %v1949_v58, %v1949_v58  ;;  %1428 = vmatpush3.bf16.msra.mxu0 %v1524_v59  ;;  %1458 = vmatpush3.bf16.msra.mxu1 %v1527_v56  ;;  %v869_v57 = vpack.c.bf16 %v1986_v52, %v1984_v51  ;;  %v322_v54 = vpop.f32.mrf.mxu0 }
 0x1d1   :  { %1429 = vmatprep.subr.bf16.mxu0 %v1525_v60  ;;  %1459 = vmatprep.subr.bf16.mxu1 %v1529_v1 }
 0x1d2   :  { %616 = vadd.xlane.f32.xlu1 %v585_v55  ;;  %v868_v55 = vpack.c.bf16 %v1982_v48, %v1980_v47  ;;  %v1392_v59 = vpop.f32.mrf.mxu0 }
 0x1d4   :  { %1430 = vmatpush3.bf16.msra.mxu0 %v1525_v60  ;;  %1460 = vmatpush3.bf16.msra.mxu1 %v1529_v1  ;;  %v325_v60 = vpop.f32.mrf.mxu0  ;;  %v1998_v1 = vadd.f32 %v1392_v59, %v1236_v12 }
 0x1d5   :  { %1431 = vmatprep.subr.bf16.mxu0 %v1526_v61  ;;  %1461 = vmatprep.subr.bf16.mxu1 %v1531_v5  ;;  %v1994_v56 = vadd.f32 %v1236_v12, %v325_v60 }
 0x1d8   :  { %1432 = vmatpush3.bf16.msra.mxu0 %v1526_v61  ;;  %1462 = vmatpush3.bf16.msra.mxu1 %v1531_v5  ;;  %v1992_v61 = vadd.f32 %v1236_v12, %v322_v54 }
 0x1d9   :  { %1433 = vmatprep.subr.bf16.mxu0 %v1528_v63  ;;  %1463 = vmatprep.subr.bf16.mxu1 %v1533_v11 }
 0x1dc   :  { %1434 = vmatpush3.bf16.msra.mxu0 %v1528_v63  ;;  %1464 = vmatpush3.bf16.msra.mxu1 %v1533_v11  ;;  %v1996_v63 = vadd.f32 %v1391_v53, %v1236_v12 }
 0x1dd   :  { %1435 = vmatprep.subr.bf16.mxu0 %v1530_v2  ;;  %1465 = vmatprep.subr.bf16.mxu1 %v1535_v24 }
 0x1de   :  { %v871_v3 = vpack.c.bf16 %v1998_v1, %v1996_v63 }
 0x1e0   :  { %1436 = vmatpush3.bf16.msra.mxu0 %v1530_v2  ;;  %1466 = vmatpush3.bf16.msra.mxu1 %v1535_v24  ;;  %v870_v2 = vpack.c.bf16 %v1994_v56, %v1992_v61 }
 0x1e1   :  { %1437 = vmatprep.subr.bf16.mxu0 %v1532_v8  ;;  %1467 = vmatprep.subr.bf16.mxu1 %v1536_v29 }
 0x1e4   :  { %1438 = vmatpush3.bf16.msra.mxu0 %v1532_v8  ;;  %1468 = vmatpush3.bf16.msra.mxu1 %v1536_v29 }
 0x1e5   :  { %1439 = vmatprep.subr.bf16.mxu0 %v1534_v16  ;;  %1469 = vmatprep.subr.bf16.mxu1 %v1537_v39 }
 0x1e8   :  { %1440 = vmatpush3.bf16.msra.mxu0 %v1534_v16  ;;  %1470 = vmatpush3.bf16.msra.mxu1 %v1537_v39 }
 0x1e9   :  { %1471 = vmatprep.subr.bf16.mxu1 %v1538_v46 }
 0x1eb   :  { %1442 = vmatmul.mubr.bf16.vlgmr.msra.gmra.mxu0 %v865_v23 }
 0x1ec   :  { %1445 = vmatprep.mubr.bf16.mxu0 %v866_v38  ;;  %1472 = vmatpush3.bf16.msra.mxu1 %v1538_v46 }
 0x1f3   :  { %1446 = vmatmul.mubr.bf16.gmra.mxu0 %v867_v40 }
 0x1f4   :  { %1449 = vmatprep.mubr.bf16.mxu0 %v868_v55  ;;  %v2007_v55 = vld [vmem:[%s2107_s5] ss:$0 sm:$0xff] }
 0x1fb   :  { %1450 = vmatmul.mubr.bf16.gmra.mxu0 %v869_v57 }
 0x1fc   :  { %1453 = vmatprep.mubr.bf16.mxu0 %v870_v2  ;;  %v2013_v2 = vld [vmem:[%s2108_s6] ss:$0 sm:$0xff] }
 0x203   :  { %1454 = vmatmul.mubr.bf16.gmra.mxu0 %v871_v3 }
 0x23b   :  { %v587_v5 = vpop.xlane.xlu0 %586 }
 0x23c   :  { %v618_v7 = vmul.f32 0.0078125, %v587_v5 }
 0x23e   :  { %v634_v8 = vadd.f32 1e-05, %v618_v7 }
 0x23f   :  { %v589_v9 = vpop.xlane.xlu1 %588  ;;  %v591_v11 = vpop.xlane.xlu0 %590 }
 0x240   :  { %1539 = vrsqrt.f32 %v634_v8  ;;  %v619_v13 = vmul.f32 0.0078125, %v589_v9  ;;  %v620_v16 = vmul.f32 0.0078125, %v591_v11 }
 0x242   :  { %v635_v21 = vadd.f32 1e-05, %v619_v13  ;;  %v636_v22 = vadd.f32 1e-05, %v620_v16 }
 0x243   :  { %v593_v12 = vpop.xlane.xlu1 %592  ;;  %v595_v23 = vpop.xlane.xlu0 %594 }
 0x244   :  { %1541 = vrsqrt.f32 %v635_v21  ;;  %v621_v24 = vmul.f32 0.0078125, %v593_v12  ;;  %v622_v27 = vmul.f32 0.0078125, %v595_v23 }
 0x245   :  { %1543 = vrsqrt.f32 %v636_v22 }
 0x246   :  { %v637_v28 = vadd.f32 1e-05, %v621_v24  ;;  %v638_v29 = vadd.f32 1e-05, %v622_v27 }
 0x247   :  { %v597_v30 = vpop.xlane.xlu1 %596  ;;  %v599_v37 = vpop.xlane.xlu0 %598 }
 0x248   :  { %1545 = vrsqrt.f32 %v637_v28  ;;  %v623_v38 = vmul.f32 0.0078125, %v597_v30  ;;  %v624_v39 = vmul.f32 0.0078125, %v599_v37 }
 0x249   :  { %1547 = vrsqrt.f32 %v638_v29 }
 0x24a   :  { %v639_v40 = vadd.f32 1e-05, %v623_v38  ;;  %v640_v43 = vadd.f32 1e-05, %v624_v39 }
 0x24b   :  { %v601_v44 = vpop.xlane.xlu1 %600  ;;  %v603_v45 = vpop.xlane.xlu0 %602 }
 0x24c   :  { %1549 = vrsqrt.f32 %v639_v40  ;;  %v625_v46 = vmul.f32 0.0078125, %v601_v44  ;;  %v626_v53 = vmul.f32 0.0078125, %v603_v45 }
 0x24d   :  { %v1540_v57 = vpop.eup %1539  ;;  %1551 = vrsqrt.f32 %v640_v43 }
 0x24e   :  { %v666_v54 = vmul.f32 %v1540_v57, %v1882_v62  ;;  %v641_v59 = vadd.f32 1e-05, %v625_v46  ;;  %v642_v60 = vadd.f32 1e-05, %v626_v53 }
 0x24f   :  { %v605_v3 = vpop.xlane.xlu1 %604  ;;  %v607_v5 = vpop.xlane.xlu0 %606 }
 0x250   :  { %v689_v7 = vmul.f32 %v2007_v55, %v666_v54  ;;  %1553 = vrsqrt.f32 %v641_v59  ;;  %v627_v8 = vmul.f32 0.0078125, %v605_v3  ;;  %v628_v9 = vmul.f32 0.0078125, %v607_v5 }
 0x251   :  { %v1542_v11 = vpop.eup %1541  ;;  %1555 = vrsqrt.f32 %v642_v60 }
 0x252   :  { %v1544_v13 = vpop.eup %1543  ;;  %v712_v16 = vadd.f32 %v2013_v2, %v689_v7  ;;  %v667_v62 = vmul.f32 %v1542_v11, %v1888_v4  ;;  %v643_v21 = vadd.f32 1e-05, %v627_v8  ;;  %v644_v22 = vadd.f32 1e-05, %v628_v9 }
 0x253   :  { %v668_v12 = vmul.f32 %v1544_v13, %v1884_v0  ;;  %v609_v23 = vpop.xlane.xlu1 %608  ;;  %v611_v24 = vpop.xlane.xlu0 %610 }
 0x254   :  { %v1264_v27 = vmul.f32 -1.442695, %v712_v16  ;;  %v690_v28 = vmul.f32 %v2007_v55, %v667_v62  ;;  %1557 = vrsqrt.f32 %v643_v21  ;;  %v629_v29 = vmul.f32 0.0078125, %v609_v23 }
 0x255   :  { %v1546_v30 = vpop.eup %1545  ;;  %v691_v37 = vmul.f32 %v2007_v55, %v668_v12  ;;  %1559 = vrsqrt.f32 %v644_v22  ;;  %v630_v38 = vmul.f32 0.0078125, %v611_v24 }
 0x256   :  { %v1548_v39 = vpop.eup %1547  ;;  %v713_v40 = vadd.f32 %v2013_v2, %v690_v28  ;;  %v669_v4 = vmul.f32 %v1546_v30, %v1890_v6  ;;  %v645_v43 = vadd.f32 1e-05, %v629_v29  ;;  %1561 = vpow2.f32 %v1264_v27 }
 0x257   :  { %v714_v0 = vadd.f32 %v2013_v2, %v691_v37  ;;  %v670_v44 = vmul.f32 %v1548_v39, %v1896_v10  ;;  %v646_v45 = vadd.f32 1e-05, %v630_v38  ;;  %v613_v46 = vpop.xlane.xlu1 %612  ;;  %v615_v53 = vpop.xlane.xlu0 %614 }
 0x258   :  { %v1265_v57 = vmul.f32 -1.442695, %v713_v40  ;;  %v692_v54 = vmul.f32 %v2007_v55, %v669_v4  ;;  %1563 = vrsqrt.f32 %v645_v43  ;;  %v631_v59 = vmul.f32 0.0078125, %v613_v46 }
 0x259   :  { %v1550_v60 = vpop.eup %1549  ;;  %v1266_v3 = vmul.f32 -1.442695, %v714_v0  ;;  %v693_v5 = vmul.f32 %v2007_v55, %v670_v44  ;;  %1565 = vrsqrt.f32 %v646_v45  ;;  %v632_v6 = vmul.f32 0.0078125, %v615_v53 }
 0x25a   :  { %v1552_v7 = vpop.eup %1551  ;;  %v715_v8 = vadd.f32 %v2013_v2, %v692_v54  ;;  %v671_v9 = vmul.f32 %v1550_v60, %v1902_v17  ;;  %v647_v10 = vadd.f32 1e-05, %v631_v59  ;;  %1567 = vpow2.f32 %v1265_v57 }
 0x25b   :  { %v716_v11 = vadd.f32 %v2013_v2, %v693_v5  ;;  %v672_v13 = vmul.f32 %v1552_v7, %v1904_v18  ;;  %v648_v16 = vadd.f32 1e-05, %v632_v6  ;;  %v617_v62 = vpop.xlane.xlu1 %616  ;;  %1569 = vpow2.f32 %v1266_v3 }
 0x25c   :  { %v1267_v21 = vmul.f32 -1.442695, %v715_v8  ;;  %v694_v22 = vmul.f32 %v2007_v55, %v671_v9  ;;  %1571 = vrsqrt.f32 %v647_v10  ;;  %v633_v12 = vmul.f32 0.0078125, %v617_v62 }
 0x25d   :  { %v1554_v23 = vpop.eup %1553  ;;  %v1268_v24 = vmul.f32 -1.442695, %v716_v11  ;;  %v695_v27 = vmul.f32 %v2007_v55, %v672_v13  ;;  %1573 = vrsqrt.f32 %v648_v16 }
 0x25e   :  { %v1556_v17 = vpop.eup %1555  ;;  %v717_v28 = vadd.f32 %v2013_v2, %v694_v22  ;;  %v673_v29 = vmul.f32 %v1554_v23, %v1910_v25  ;;  %v649_v30 = vadd.f32 1e-05, %v633_v12  ;;  %1575 = vpow2.f32 %v1267_v21 }
 0x25f   :  { %v718_v18 = vadd.f32 %v2013_v2, %v695_v27  ;;  %v674_v37 = vmul.f32 %v1556_v17, %v1912_v26  ;;  %1577 = vpow2.f32 %v1268_v24 }
 0x260   :  { %v1269_v38 = vmul.f32 -1.442695, %v717_v28  ;;  %v696_v39 = vmul.f32 %v2007_v55, %v673_v29  ;;  %1579 = vrsqrt.f32 %v649_v30 }
 0x261   :  { %v1558_v40 = vpop.eup %1557  ;;  %v1270_v4 = vmul.f32 -1.442695, %v718_v18  ;;  %v697_v43 = vmul.f32 %v2007_v55, %v674_v37 }
 0x262   :  { %v1560_v0 = vpop.eup %1559  ;;  %v719_v44 = vadd.f32 %v2013_v2, %v696_v39  ;;  %v675_v25 = vmul.f32 %v1558_v40, %v1919_v33  ;;  %1581 = vpow2.f32 %v1269_v38 }
 0x263   :  { %v1562_v45 = vpop.eup %1561  ;;  %v720_v46 = vadd.f32 %v2013_v2, %v697_v43  ;;  %v676_v26 = vmul.f32 %v1560_v0, %v1922_v34  ;;  %1583 = vpow2.f32 %v1270_v4 }
 0x264   :  { %v1271_v53 = vmul.f32 -1.442695, %v719_v44  ;;  %v698_v57 = vmul.f32 %v2007_v55, %v675_v25  ;;  %v776_v54 = vadd.f32 1.0, %v1562_v45 }
 0x265   :  { %v1564_v59 = vpop.eup %1563  ;;  %v1272_v60 = vmul.f32 -1.442695, %v720_v46  ;;  %v699_v3 = vmul.f32 %v2007_v55, %v676_v26 }
 0x266   :  { %v1566_v5 = vpop.eup %1565  ;;  %v721_v6 = vadd.f32 %v2013_v2, %v698_v57  ;;  %v677_v33 = vmul.f32 %v1564_v59, %v1929_v41  ;;  %1585 = vrcp.f32 %v776_v54 }
 0x267   :  { %v1568_v7 = vpop.eup %1567  ;;  %v722_v8 = vadd.f32 %v2013_v2, %v699_v3  ;;  %v678_v34 = vmul.f32 %v1566_v5, %v1932_v42  ;;  %1587 = vpow2.f32 %v1271_v53 }
 0x268   :  { %v1570_v9 = vpop.eup %1569  ;;  %v700_v10 = vmul.f32 %v2007_v55, %v677_v33  ;;  %v777_v11 = vadd.f32 1.0, %v1568_v7  ;;  %1589 = vpow2.f32 %v1272_v60  ;;  %v1273_v16 = vmul.f32 -1.442695, %v721_v6 }
 0x269   :  { %v1572_v13 = vpop.eup %1571  ;;  %v1274_v62 = vmul.f32 -1.442695, %v722_v8  ;;  %v701_v21 = vmul.f32 %v2007_v55, %v678_v34  ;;  %v778_v22 = vadd.f32 1.0, %v1570_v9 }
 0x26a   :  { %v1574_v12 = vpop.eup %1573  ;;  %v723_v41 = vadd.f32 %v2013_v2, %v700_v10  ;;  %v679_v23 = vmul.f32 %v1572_v13, %v1939_v49  ;;  %1591 = vrcp.f32 %v777_v11 }
 0x26b   :  { %v1576_v24 = vpop.eup %1575  ;;  %v724_v42 = vadd.f32 %v2013_v2, %v701_v21  ;;  %v680_v27 = vmul.f32 %v1574_v12, %v1942_v50  ;;  %1593 = vrcp.f32 %v778_v22 }
 0x26c   :  { %v1578_v17 = vpop.eup %1577  ;;  %v1275_v28 = vmul.f32 -1.442695, %v723_v41  ;;  %v702_v29 = vmul.f32 %v2007_v55, %v679_v23  ;;  %v779_v30 = vadd.f32 1.0, %v1576_v24  ;;  %1595 = vpow2.f32 %v1274_v62 }
 0x26d   :  { %v1580_v18 = vpop.eup %1579  ;;  %v1276_v37 = vmul.f32 -1.442695, %v724_v42  ;;  %v703_v38 = vmul.f32 %v2007_v55, %v680_v27  ;;  %v780_v39 = vadd.f32 1.0, %v1578_v17  ;;  %1597 = vpow2.f32 %v1273_v16 }
 0x26e   :  { %v725_v49 = vadd.f32 %v2013_v2, %v702_v29  ;;  %v681_v40 = vmul.f32 %v1580_v18, %v1949_v58  ;;  %1599 = vrcp.f32 %v779_v30 }
 0x26f   :  { %v1582_v4 = vpop.eup %1581  ;;  %v726_v50 = vadd.f32 %v2013_v2, %v703_v38  ;;  %1601 = vrcp.f32 %v780_v39 }
 0x270   :  { %v1584_v43 = vpop.eup %1583  ;;  %v704_v0 = vmul.f32 %v2007_v55, %v681_v40  ;;  %v781_v44 = vadd.f32 1.0, %v1582_v4  ;;  %1603 = vpow2.f32 %v1275_v28  ;;  %v1277_v25 = vmul.f32 -1.442695, %v725_v49 }
 0x271   :  { %v1278_v45 = vmul.f32 -1.442695, %v726_v50  ;;  %v782_v46 = vadd.f32 1.0, %v1584_v43  ;;  %1605 = vpow2.f32 %v1276_v37 }
 0x272   :  { %v727_v26 = vadd.f32 %v2013_v2, %v704_v0  ;;  %1607 = vrcp.f32 %v781_v44 }
 0x273   :  { %v1586_v53 = vpop.eup %1585  ;;  %1609 = vpow2.f32 %v1278_v45 }
 0x274   :  { %v1588_v58 = vpop.eup %1587  ;;  %v1279_v57 = vmul.f32 -1.442695, %v727_v26  ;;  %1611 = vrcp.f32 %v782_v46  ;;  %v824_v5 = vmul.f32 %v1586_v53, %v1956_v14 }
 0x275   :  { %v1590_v54 = vpop.eup %1589  ;;  %v783_v59 = vadd.f32 1.0, %v1588_v58  ;;  %1613 = vpow2.f32 %v1277_v25 }
 0x276   :  { %1615 = vpow2.f32 %v1279_v57  ;;  %v784_v55 = vadd.f32 1.0, %v1590_v54 }
 0x277   :  { %v1592_v60 = vpop.eup %1591  ;;  %1617 = vrcp.f32 %v783_v59 }
 0x278   :  { %v1594_v3 = vpop.eup %1593  ;;  %v825_v6 = vmul.f32 %v1592_v60, %v1958_v15  ;;  %1619 = vrcp.f32 %v784_v55 }
 0x279   :  { %v1596_v33 = vpop.eup %1595  ;;  %v826_v11 = vmul.f32 %v1594_v3, %v1960_v19 }
 0x27a   :  { %v1598_v2 = vpop.eup %1597  ;;  %v786_v7 = vadd.f32 1.0, %v1596_v33  ;;  %v840_v8 = vpack.c.bf16 %v825_v6, %v824_v5 }
 0x27b   :  { %v1600_v34 = vpop.eup %1599  ;;  %v785_v9 = vadd.f32 1.0, %v1598_v2 }
 0x27c   :  { %v1602_v10 = vpop.eup %1601  ;;  %v827_v13 = vmul.f32 %v1600_v34, %v1962_v20  ;;  %1473 = vmatprep.mubr.bf16.mxu1 %v840_v8 }
 0x27d   :  { %v1604_v16 = vpop.eup %1603  ;;  %1621 = vrcp.f32 %v785_v9  ;;  %v828_v41 = vmul.f32 %v1602_v10, %v1970_v32 }
 0x27e   :  { %v1606_v62 = vpop.eup %1605  ;;  %v841_v21 = vpack.c.bf16 %v827_v13, %v826_v11  ;;  %1623 = vrcp.f32 %v786_v7  ;;  %v787_v14 = vadd.f32 1.0, %v1604_v16 }
 0x27f   :  { %v1608_v15 = vpop.eup %1607  ;;  %v788_v22 = vadd.f32 1.0, %v1606_v62 }
 0x280   :  { %v1610_v12 = vpop.eup %1609  ;;  %v829_v23 = vmul.f32 %v1608_v15, %v1972_v35  ;;  %1625 = vrcp.f32 %v787_v14  ;;  %1474 = vmatmul.mubr.bf16.vlgmr.msra.gmra.mxu1 %v841_v21 }
 0x281   :  { %v1612_v24 = vpop.eup %1611  ;;  %v790_v19 = vadd.f32 1.0, %v1610_v12  ;;  %1627 = vrcp.f32 %v788_v22 }
 0x282   :  { %v1614_v42 = vpop.eup %1613  ;;  %v842_v20 = vpack.c.bf16 %v829_v23, %v828_v41  ;;  %v830_v30 = vmul.f32 %v1612_v24, %v1968_v31 }
 0x283   :  { %v1616_v27 = vpop.eup %1615  ;;  %v789_v17 = vadd.f32 1.0, %v1614_v42  ;;  %1629 = vrcp.f32 %v790_v19 }
 0x284   :  { %v1618_v28 = vpop.eup %1617  ;;  %v791_v29 = vadd.f32 1.0, %v1616_v27  ;;  %1477 = vmatprep.mubr.bf16.mxu1 %v842_v20 }
 0x285   :  { %v831_v18 = vmul.f32 %v1618_v28, %v1974_v36  ;;  %1631 = vrcp.f32 %v789_v17  ;;  %v1620_v35 = vpop.eup %1619 }
 0x286   :  { %1633 = vrcp.f32 %v791_v29  ;;  %v832_v39 = vmul.f32 %v1620_v35, %v1980_v47 }
 0x287   :  { %v843_v32 = vpack.c.bf16 %v831_v18, %v830_v30 }
 0x289   :  { %1478 = vmatmul.mubr.bf16.gmra.mxu1 %v843_v32 }
 0x28a   :  { %v1622_v37 = vpop.eup %1621 }
 0x28b   :  { %v1624_v38 = vpop.eup %1623  ;;  %v833_v49 = vmul.f32 %v1622_v37, %v1982_v48 }
 0x28c   :  { %v834_v50 = vmul.f32 %v1624_v38, %v1984_v51 }
 0x28d   :  { %v1626_v40 = vpop.eup %1625  ;;  %v844_v4 = vpack.c.bf16 %v833_v49, %v832_v39 }
 0x28e   :  { %v835_v43 = vmul.f32 %v1626_v40, %v1986_v52  ;;  %v1628_v31 = vpop.eup %1627 }
 0x28f   :  { %1481 = vmatprep.mubr.bf16.mxu1 %v844_v4  ;;  %v836_v45 = vmul.f32 %v1628_v31, %v1992_v61  ;;  %v2081_v61 = vld [vmem:[%s2111_s9] ss:$0 sm:$0xff]  ;;  %s1770_s9 = smov [#allocation11]  }
 0x290   :  { %v845_v36 = vpack.c.bf16 %v835_v43, %v834_v50  ;;  %v1630_v0 = vpop.eup %1629  ;;  %s1222_s21 = sshll.u32 %s1770_s9, 4  ;;  %s1223_s21 = int_to_ptr.vmem [resolvable:$true] %s1222_s21 }
 0x291   :  { %v838_v47 = vmul.f32 %v1630_v0, %v1996_v63  ;;  %s1735_s22 = scalar_lea.vmem %s1223_s21, 2048  ;;  %p1740_p12 = scmp.lt.s32.totalorder %s1223_s21, %s1223_s21 }
 0x292   :  { %v1632_v44 = vpop.eup %1631  ;;  %1482 = vmatmul.mubr.bf16.gmra.mxu1 %v845_v36  ;;  %p1736_p11 = scmp.ne.s32.totalorder %s1223_s21, %s1735_s22  ;;  %p1741_p13 = scmp.lt.s32.totalorder %s1735_s22, %s1735_s22 }
 0x293   :  { %v1634_v25 = vpop.eup %1633  ;;  %v837_v46 = vmul.f32 %v1632_v44, %v1994_v56 }
 0x294   :  { %v839_v48 = vmul.f32 %v1634_v25, %v1998_v1  ;;  %p1742_p0 = por %p1741_p13, %p1740_p12 }
 0x295   :  { %v846_v26 = vpack.c.bf16 %v837_v46, %v836_v45 }
 0x296   :  { %v847_v53 = vpack.c.bf16 %v839_v48, %v838_v47  ;;  %p1743_p1 = pnand %p1742_p0, %p1736_p11 }
 0x297   :  { %1485 = vmatprep.mubr.bf16.mxu1 %v846_v26 }
 0x29a   :  { %1486 = vmatmul.mubr.bf16.gmra.mxu1 %v847_v53 }
 0x2ab   :  { %v1443_v51 = vpop.f32.mrf.mxu0 }
 0x2ad   :  { %v970_v52 = vpop.f32.mrf.mxu0 }
 0x2af   :  { %v1444_v58 = vpop.f32.mrf.mxu0 }
 0x2b1   :  { %v973_v57 = vpop.f32.mrf.mxu0 }
 0x2b3   :  { %v1447_v54 = vpop.f32.mrf.mxu0 }
 0x2b5   :  { %v986_v59 = vpop.f32.mrf.mxu0 }
 0x2b7   :  { %v1448_v60 = vpop.f32.mrf.mxu0 }
 0x2b9   :  { %v989_v55 = vpop.f32.mrf.mxu0 }
 0x2bb   :  { %v1451_v6 = vpop.f32.mrf.mxu0 }
 0x2bd   :  { %v1002_v10 = vpop.f32.mrf.mxu0 }
 0x2bf   :  { %v1452_v21 = vpop.f32.mrf.mxu0 }
 0x2c1   :  { %v1005_v24 = vpop.f32.mrf.mxu0 }
 0x2c3   :  { %v1455_v28 = vpop.f32.mrf.mxu0 }
 0x2c5   :  { %v1018_v38 = vpop.f32.mrf.mxu0 }
 0x2c7   :  { %v1456_v31 = vpop.f32.mrf.mxu0 }
 0x2c9   :  { %v1021_v47 = vpop.f32.mrf.mxu0 }
 0x340   :  { %v1475_v3 = vpop.f32.mrf.mxu1 }
 0x341   :  { %v1124_v56 = vadd.f32 %v1475_v3, %v1443_v51 }
 0x342   :  { %v1115_v63 = vpop.f32.mrf.mxu1 }
 0x343   :  { %v1187_v1 = vadd.f32 %v2081_v61, %v1124_v56  ;;  %v1116_v5 = vadd.f32 %v1115_v63, %v970_v52 }
 0x344   :  { %v1476_v33 = vpop.f32.mrf.mxu1 }
 0x345   :  { %1203 = vst [vmem:[#allocation11 + $0x10] sm:$0xff] %v1187_v1  ;;  %v1185_v2 = vadd.f32 %v2081_v61, %v1116_v5  ;;  %v1127_v7 = vadd.f32 %v1476_v33, %v1444_v58 }
 0x346   :  { %v1118_v8 = vpop.f32.mrf.mxu1 }
 0x347   :  { %1201 = vst [vmem:[#allocation11] sm:$0xff] %v1185_v2  ;;  %v1188_v34 = vadd.f32 %v2081_v61, %v1127_v7  ;;  %v1119_v9 = vadd.f32 %v1118_v8, %v973_v57 }
 0x349   :  { %1204 = vst [vmem:[#allocation11 + $0x18] sm:$0xff] %v1188_v34  ;;  %v1186_v11 = vadd.f32 %v2081_v61, %v1119_v9  ;;  %v1479_v13 = vpop.f32.mrf.mxu1 }
 0x34a   :  { %v1140_v16 = vadd.f32 %v1479_v13, %v1447_v54 }
 0x34b   :  { %1202 = vst [vmem:[#allocation11 + $0x8] sm:$0xff] %v1186_v11  ;;  %v1131_v62 = vpop.f32.mrf.mxu1 }
 0x34c   :  { %v1191_v14 = vadd.f32 %v2081_v61, %v1140_v16  ;;  %v1132_v15 = vadd.f32 %v1131_v62, %v986_v59 }
 0x34d   :  { %v1480_v22 = vpop.f32.mrf.mxu1 }
 0x34e   :  { %1207 = vst [vmem:[#allocation11 + $0x30] sm:$0xff] %v1191_v14  ;;  %v1189_v12 = vadd.f32 %v2081_v61, %v1132_v15  ;;  %v1143_v41 = vadd.f32 %v1480_v22, %v1448_v60 }
 0x34f   :  { %v1134_v23 = vpop.f32.mrf.mxu1 }
 0x350   :  { %1205 = vst [vmem:[#allocation11 + $0x20] sm:$0xff] %v1189_v12  ;;  %v1192_v19 = vadd.f32 %v2081_v61, %v1143_v41  ;;  %v1135_v42 = vadd.f32 %v1134_v23, %v989_v55 }
 0x352   :  { %1208 = vst [vmem:[#allocation11 + $0x38] sm:$0xff] %v1192_v19  ;;  %v1190_v20 = vadd.f32 %v2081_v61, %v1135_v42  ;;  %v1483_v27 = vpop.f32.mrf.mxu1 }
 0x353   :  { %v1156_v17 = vadd.f32 %v1483_v27, %v1451_v6 }
 0x354   :  { %1206 = vst [vmem:[#allocation11 + $0x28] sm:$0xff] %v1190_v20  ;;  %v1147_v29 = vpop.f32.mrf.mxu1 }
 0x355   :  { %v1195_v30 = vadd.f32 %v2081_v61, %v1156_v17  ;;  %v1148_v18 = vadd.f32 %v1147_v29, %v1002_v10 }
 0x356   :  { %v1484_v32 = vpop.f32.mrf.mxu1 }
 0x357   :  { %1211 = vst [vmem:[#allocation11 + $0x50] sm:$0xff] %v1195_v30  ;;  %v1193_v35 = vadd.f32 %v2081_v61, %v1148_v18  ;;  %v1159_v37 = vadd.f32 %v1484_v32, %v1452_v21 }
 0x358   :  { %v1150_v39 = vpop.f32.mrf.mxu1 }
 0x359   :  { %1209 = vst [vmem:[#allocation11 + $0x40] sm:$0xff] %v1193_v35  ;;  %v1196_v49 = vadd.f32 %v2081_v61, %v1159_v37  ;;  %v1151_v40 = vadd.f32 %v1150_v39, %v1005_v24 }
 0x35a   :  { %v1487_v4 = vpop.f32.mrf.mxu1 }
 0x35b   :  { %1212 = vst [vmem:[#allocation11 + $0x58] sm:$0xff] %v1196_v49  ;;  %v1194_v50 = vadd.f32 %v2081_v61, %v1151_v40  ;;  %v1172_v43 = vadd.f32 %v1487_v4, %v1455_v28 }
 0x35c   :  { %v1163_v36 = vpop.f32.mrf.mxu1 }
 0x35d   :  { %1210 = vst [vmem:[#allocation11 + $0x48] sm:$0xff] %v1194_v50  ;;  %v1199_v0 = vadd.f32 %v2081_v61, %v1172_v43  ;;  %v1164_v44 = vadd.f32 %v1163_v36, %v1018_v38 }
 0x35e   :  { %v1488_v25 = vpop.f32.mrf.mxu1 }
 0x35f   :  { %1215 = vst [vmem:[#allocation11 + $0x70] sm:$0xff] %v1199_v0  ;;  %v1197_v45 = vadd.f32 %v2081_v61, %v1164_v44  ;;  %v1175_v46 = vadd.f32 %v1488_v25, %v1456_v31 }
 0x360   :  { %v1166_v48 = vpop.f32.mrf.mxu1 }
 0x361   :  { %1213 = vst [vmem:[#allocation11 + $0x60] sm:$0xff] %v1197_v45  ;;  %v1200_v26 = vadd.f32 %v2081_v61, %v1175_v46  ;;  %v1167_v53 = vadd.f32 %v1166_v48, %v1021_v47 }
 0x363   :  { %1216 = vst [vmem:[#allocation11 + $0x78] sm:$0xff] %v1200_v26  ;;  %v1198_v51 = vadd.f32 %v2081_v61, %v1167_v53 }
 0x365   :  { %1214 = vst [vmem:[#allocation11 + $0x68] sm:$0xff] %v1198_v51 }
 0x366   :  { %1746 = shalt.err (!%p1743_p1)
}
 0x367   :  { %s1771_s23 = smov 128   ;;  %s1772_s24 = smov 8  }
 0x368   :  { %1228 = dma.vmem_to_hbm [thread:$0]  %s1223_s21, 2048, %s2112_s10, [#allocation4], %s1771_s23, %s1771_s23, %s1772_s24  }
 0x369   :  { %1761 = dma.done.wait [#allocation4], 2048  }
 0x36a   :  { %1762 = vsyncadd [#allocation4], 4294965248 }
 0x36b   :  { %1232 = vsyncpa [#allocation3], 1 }
 0x36c   :  { %1233 = vsyncpa [#allocation6], 1 }
 0x36d   :  { %1234 = vsyncpa [#allocation9], 1 }
 0x36e   :  { %1235 = vsyncpa [#allocation4], 1 }

</bundles_post_ra>
